<compile_context>
chip_gen: v7x
topology: tpu7x:2x2x1
jax: 0.10.0
libtpu: 0.0.40
codegen_flags: <defaults>
</compile_context>

<pallas_src>
import functools

import jax
import jax.numpy as jnp
from jax.experimental import pallas as pl
from jax.experimental.pallas import tpu as pltpu


def _linear_kernel(x_ref, w_ref, b_ref, o_ref, acc_ref):
    # x_ref : [tm, tk]   activation tile
    # w_ref : [tk, tn]   weight tile, pre-transposed to [K, N] in the wrapper
    # b_ref : [1,  tn]   bias tile
    # o_ref : [tm, tn]   output tile
    # acc_ref: [tm, tn]  f32 accumulator (VMEM scratch, resident across k)
    k = pl.program_id(2)

    @pl.when(k == 0)
    def _():
        # Seed the accumulator with the bias -> no epilogue add needed.
        acc_ref[...] = jnp.broadcast_to(
            b_ref[...].astype(jnp.float32), acc_ref.shape
        )

    # Canonical (tm,tk) @ (tk,tn) contraction; MXU-native layout, f32 acc.
    acc_ref[...] += jnp.dot(
        x_ref[...], w_ref[...], preferred_element_type=jnp.float32
    )

    @pl.when(k == pl.num_programs(2) - 1)
    def _():
        o_ref[...] = acc_ref[...].astype(o_ref.dtype)


def _round_up(a, b):
    return (a + b - 1) // b * b


def _sublane(dtype):
    # f32 -> 8, bf16/f16 -> 16, int8/fp8 -> 32 (sub-32-bit dtypes pack sublanes).
    return max(8, 32 // jnp.dtype(dtype).itemsize)


def base_head_forward(
    cls_feat,
    weight,
    bias,
    *,
    tm=None,
    tn=None,
    tk=None,
    compute_dtype=None,
    force_pallas=False,
):
    """nn.Linear forward.

    cls_feat: [B, in_features]
    weight  : [num_class, in_features]   (nn.Linear layout)
    bias    : [num_class]
    compute_dtype: optional streaming dtype for x / weight (e.g. jnp.bfloat16);
        the head is weight-HBM-bound so bf16 halves weight bytes.  Accumulation
        is always f32; output keeps cls_feat.dtype.  Default None = exact f32.
    """
    B, K = cls_feat.shape
    N, K_w = weight.shape
    assert K == K_w, "weight in_features mismatch"
    out_dtype = cls_feat.dtype

    # ---- Tiny-shape fast path: a <= one-tile problem is pure launch overhead.
    if not force_pallas and (B <= 256 and N <= 256 and K <= 512):
        return (cls_feat @ weight.T + bias).astype(out_dtype)

    # ---- Optional low-precision streaming (weights are the HBM bottleneck).
    x = cls_feat if compute_dtype is None else cls_feat.astype(compute_dtype)
    w = weight if compute_dtype is None else weight.astype(compute_dtype)
    stream_dtype = x.dtype
    sub = _sublane(stream_dtype)

    # ---- Tile sizes (sublane / lane aligned; dtype-aware caps).
    is_32bit = jnp.dtype(stream_dtype).itemsize == 4
    tk_cap = 2048 if is_32bit else 4096
    if tm is None:
        tm = min(_round_up(B, sub), 512)      # whole batch in one tile if possible
    if tn is None:
        tn = min(_round_up(N, 128), 512)      # lane-dense output (multiple of 128)
    if tk is None:
        tk = min(_round_up(K, 128), tk_cap)   # few k steps -> few acc round-trips

    B_p = _round_up(B, tm)
    N_p = _round_up(N, tn)
    K_p = _round_up(K, tk)

    # v7x megacore: if the batch fits in one i tile, try to expose >= 2 parallel
    # j tiles so both TensorCores get work (no-op on v5e/v6e single-TC chips).
    if B_p // tm == 1 and N_p // tn == 1 and tn % 256 == 0:
        tn //= 2

    grid = (B_p // tm, N_p // tn, K_p // tk)
    grid_i, grid_j, grid_k = grid

    # ---- Pad operands to tile boundaries (no-op for aligned shapes).
    x_p = x
    if (B_p, K_p) != (B, K):
        x_p = jnp.pad(x, ((0, B_p - B), (0, K_p - K)))
    # Pre-transpose the (static) weight to [K, N] once; in a real model this is
    # done at parameter-load time, so the kernel never transposes a tile.
    w_t = w.T
    if (K_p, N_p) != (K, N):
        w_t = jnp.pad(w_t, ((0, K_p - K), (0, N_p - N)))
    b_p = bias
    if N_p != N:
        b_p = jnp.pad(bias, (0, N_p - N))
    b2d = b_p.reshape(1, N_p)

    # ---- VMEM budget: double-buffered inputs/outputs + f32 accumulator.
    x_item = x_p.dtype.itemsize
    w_item = w_t.dtype.itemsize
    b_item = b2d.dtype.itemsize
    o_item = jnp.dtype(out_dtype).itemsize
    working_set = (
        2 * (tm * tk * x_item + tk * tn * w_item + tn * b_item)  # double-buffered ins
        + 2 * tm * tn * o_item                                   # double-buffered out
        + tm * tn * 4                                            # accumulator
    )
    vmem_limit = int(min(max(working_set * 3 // 2 + (8 << 20), 16 << 20), 48 << 20))

    cost = pl.CostEstimate(
        flops=2 * B_p * K_p * N_p,
        transcendentals=0,
        bytes_accessed=(
            x_p.size * x_item * grid_j        # x re-read once per j tile
            + w_t.size * w_item * grid_i      # weight re-read once per i tile
            + b2d.size * b_item * grid_i
            + B_p * N_p * o_item
        ),
    )

    out_p = pl.pallas_call(
        _linear_kernel,
        out_shape=jax.ShapeDtypeStruct((B_p, N_p), out_dtype),
        grid_spec=pltpu.PrefetchScalarGridSpec(
            num_scalar_prefetch=0,
            grid=grid,
            in_specs=[
                pl.BlockSpec((tm, tk), lambda i, j, k: (i, k)),   # x
                pl.BlockSpec((tk, tn), lambda i, j, k: (k, j)),   # weight [K, N]
                pl.BlockSpec((1, tn), lambda i, j, k: (0, j)),    # bias
            ],
            out_specs=pl.BlockSpec((tm, tn), lambda i, j, k: (i, j)),
            scratch_shapes=[pltpu.VMEM((tm, tn), jnp.float32)],
        ),
        compiler_params=pltpu.CompilerParams(
            dimension_semantics=("parallel", "parallel", "arbitrary"),
            vmem_limit_bytes=vmem_limit,
        ),
        cost_estimate=cost,
    )(x_p, w_t, b2d)

    if (B_p, N_p) != (B, N):
        out_p = out_p[:B, :N]
    return out_p


if __name__ == "__main__":
    # Small shapes consistent with the module:
    #   Out_Features (in_features) = 32, Num_class = 8, batch = 2
    B, in_features, num_class = 2, 32, 8

    key = jax.random.PRNGKey(0)
    k_x, k_w, k_b = jax.random.split(key, 3)

    cls_feat = jax.random.normal(k_x, (B, in_features), dtype=jnp.float32)
    # Deterministic parameter init (mimics nn.Linear's uniform(-1/sqrt(in), 1/sqrt(in)))
    bound = 1.0 / jnp.sqrt(jnp.float32(in_features))
    weight = jax.random.uniform(
        k_w, (num_class, in_features), minval=-bound, maxval=bound, dtype=jnp.float32
    )
    bias = jax.random.uniform(
        k_b, (num_class,), minval=-bound, maxval=bound, dtype=jnp.float32
    )
    # NOTE: classifier.bias.requires_grad_(False) is training-only; forward math
    # is identical to a plain Linear.

    # Exercise the Pallas kernel (force past the tiny-shape fast path).
    fwd_pallas = jax.jit(
        functools.partial(base_head_forward, force_pallas=True)
    )
    out = jax.block_until_ready(fwd_pallas(cls_feat, weight, bias))

    # Default path (fast path for this tiny shape) must agree as well.
    out_fast = jax.block_until_ready(base_head_forward(cls_feat, weight, bias))

    # Reference check against plain JAX (== torch.nn.Linear forward).
    ref = cls_feat @ weight.T + bias
    assert out.shape == (B, num_class)
    assert jnp.allclose(out, ref, atol=1e-5, rtol=1e-5)
    assert jnp.allclose(out_fast, ref, atol=1e-5, rtol=1e-5)

    print("KERNEL_OK")
</pallas_src>

<mosaic_0001>
module attributes {stable_mosaic.version = 11 : i64} {
  func.func @_linear_kernel(%arg0: i32, %arg1: i32, %arg2: i32, %arg3: memref<8x128xf32, #tpu.memory_space<vmem>>, %arg4: memref<128x128xf32, #tpu.memory_space<vmem>>, %arg5: memref<1x128xf32, #tpu.memory_space<vmem>>, %arg6: memref<8x128xf32, #tpu.memory_space<vmem>>, %arg7: memref<8x128xf32, #tpu.memory_space<vmem>>) attributes {dimension_semantics = [#tpu.dimension_semantics<parallel>, #tpu.dimension_semantics<parallel>, #tpu.dimension_semantics<arbitrary>], iteration_bounds = array<i64: 1, 1, 1>, scalar_prefetch = 0 : i64, scratch_operands = 1 : i64, tpu.core_type = #tpu.core_type<tc>, window_params = [{transform_indices = @transform_0, window_bounds = array<i64: 8, 128>}, {transform_indices = @transform_1, window_bounds = array<i64: 128, 128>}, {transform_indices = @transform_2, window_bounds = array<i64: 1, 128>}, {transform_indices = @transform_3, window_bounds = array<i64: 8, 128>}]} {
    %c0_i32 = arith.constant 0 : i32
    %0 = arith.cmpi eq, %arg2, %c0_i32 : i32
    %1 = arith.extui %0 : i1 to i32
    %c0_i32_0 = arith.constant 0 : i32
    %2 = arith.cmpi ne, %1, %c0_i32_0 : i32
    scf.if %2 {
      %c0_10 = arith.constant 0 : index
      %c0_11 = arith.constant 0 : index
      %12 = vector.load %arg5[%c0_10, %c0_11] : memref<1x128xf32, #tpu.memory_space<vmem>>, vector<1x128xf32>
      %13 = vector.shape_cast %12 : vector<1x128xf32> to vector<1x128xf32>
      %14 = vector.broadcast %13 : vector<1x128xf32> to vector<8x128xf32>
      %c0_12 = arith.constant 0 : index
      %c0_13 = arith.constant 0 : index
      %15 = vector.load %arg7[%c0_12, %c0_13] : memref<8x128xf32, #tpu.memory_space<vmem>>, vector<8x128xf32>
      tpu.vector_store %arg7[%c0_12, %c0_13], %14 {strides = array<i32>} : memref<8x128xf32, #tpu.memory_space<vmem>>, vector<8x128xf32>,
    } else {
    }
    %c0 = arith.constant 0 : index
    %c0_1 = arith.constant 0 : index
    %3 = vector.load %arg7[%c0, %c0_1] : memref<8x128xf32, #tpu.memory_space<vmem>>, vector<8x128xf32>
    %c0_2 = arith.constant 0 : index
    %c0_3 = arith.constant 0 : index
    %4 = vector.load %arg3[%c0_2, %c0_3] : memref<8x128xf32, #tpu.memory_space<vmem>>, vector<8x128xf32>
    %c0_4 = arith.constant 0 : index
    %c0_5 = arith.constant 0 : index
    %5 = vector.load %arg4[%c0_4, %c0_5] : memref<128x128xf32, #tpu.memory_space<vmem>>, vector<128x128xf32>
    %cst = arith.constant dense<0.000000e+00> : vector<8x128xf32>
    %6 = tpu.matmul %4, %5, %cst {dimension_numbers = #tpu.dot_dimension_numbers<[1], [0], [0], [1], [0, 0, 1, 1], [], []>} : vector<8x128xf32>, vector<128x128xf32>, vector<8x128xf32> -> vector<8x128xf32>
    %7 = arith.addf %3, %6 : vector<8x128xf32>
    %c0_6 = arith.constant 0 : index
    %c0_7 = arith.constant 0 : index
    %8 = vector.load %arg7[%c0_6, %c0_7] : memref<8x128xf32, #tpu.memory_space<vmem>>, vector<8x128xf32>
    tpu.vector_store %arg7[%c0_6, %c0_7], %7 {strides = array<i32>} : memref<8x128xf32, #tpu.memory_space<vmem>>, vector<8x128xf32>,
    %c0_i32_8 = arith.constant 0 : i32
    %9 = arith.cmpi eq, %arg2, %c0_i32_8 : i32
    %10 = arith.extui %9 : i1 to i32
    %c0_i32_9 = arith.constant 0 : i32
    %11 = arith.cmpi ne, %10, %c0_i32_9 : i32
    scf.if %11 {
      %c0_10 = arith.constant 0 : index
      %c0_11 = arith.constant 0 : index
      %12 = vector.load %arg7[%c0_10, %c0_11] : memref<8x128xf32, #tpu.memory_space<vmem>>, vector<8x128xf32>
      %c0_12 = arith.constant 0 : index
      %c0_13 = arith.constant 0 : index
      %13 = vector.load %arg6[%c0_12, %c0_13] : memref<8x128xf32, #tpu.memory_space<vmem>>, vector<8x128xf32>
      tpu.vector_store %arg6[%c0_12, %c0_13], %12 {strides = array<i32>} : memref<8x128xf32, #tpu.memory_space<vmem>>, vector<8x128xf32>,
    } else {
    }
    return
  }
  func.func @transform_0(%arg0: i32, %arg1: i32, %arg2: i32) -> (i32, i32) {
    %c0_i32 = arith.constant 0 : i32
    return %arg0, %arg2 : i32, i32
  }
  func.func @transform_1(%arg0: i32, %arg1: i32, %arg2: i32) -> (i32, i32) {
    %c0_i32 = arith.constant 0 : i32
    return %arg2, %arg1 : i32, i32
  }
  func.func @transform_2(%arg0: i32, %arg1: i32, %arg2: i32) -> (i32, i32) {
    %c0_i32 = arith.constant 0 : i32
    %c0_i32_0 = arith.constant 0 : i32
    return %c0_i32, %arg1 : i32, i32
  }
  func.func @transform_3(%arg0: i32, %arg1: i32, %arg2: i32) -> (i32, i32) {
    %c0_i32 = arith.constant 0 : i32
    return %arg0, %arg1 : i32, i32
  }
}

</mosaic_0001>

<bundles_post_ra>
// kernel: base_head_forward.1
= control target key start
LH: loop header
LB: loop body
LE: loop exit
PB: predicated region body
PF: predicated region fallthrough
CT: control target
= control target key end

     0   :  { %v205_v0 = vmov 0.0|0.0   ;;  %vm206_vm0 = vmmov 0   ;;  %v207_v4 = vmov 0.0   ;;  %s285_s1 = inlined_call_operand.vmem [shape: f32[128,128], index: 1, kind: input, shape index: {}]   ;;  %s286_s0 = inlined_call_operand.vmem [shape: f32[8,128], index: 0, kind: input, shape index: {}]   ;;  %s287_s2 = inlined_call_operand.vmem [shape: f32[1,128], index: 2, kind: input, shape index: {}]   ;;  %s288_s3 = inlined_call_operand.vmem [shape: f32[8,128], index: 3, kind: output, shape index: {}]  }
   0x1   :  { %178 = vmatprep.subr.bf16.mxu0 %v205_v0  ;;  %v28_v1 = vld [vmem:[%s285_s1] sm:$0xff]  ;;  %v29_v2 = vld [vmem:[%s285_s1 + $0x8] sm:$0xff]  ;;  %v30_v3 = vld [vmem:[%s285_s1 + $0x10] sm:$0xff]  ;;  %175 = vmatprep.mubr.msk.f32.mxu0 %vm206_vm0, %v207_v4 }
   0x2   :  { %v179_v5 = vpack.c.bf16 %v29_v2, %v28_v1  ;;  %v31_v6 = vld [vmem:[%s285_s1 + $0x18] sm:$0xff]  ;;  %v32_v8 = vld [vmem:[%s285_s1 + $0x20] sm:$0xff]  ;;  %v33_v9 = vld [vmem:[%s285_s1 + $0x28] sm:$0xff] }
   0x3   :  { %v182_v7 = vpack.c.bf16 %v31_v6, %v30_v3  ;;  %v185_v10 = vpack.c.bf16 %v33_v9, %v32_v8  ;;  %v34_v11 = vld [vmem:[%s285_s1 + $0x30] sm:$0xff]  ;;  %v35_v12 = vld [vmem:[%s285_s1 + $0x38] sm:$0xff]  ;;  %v36_v14 = vld [vmem:[%s285_s1 + $0x40] sm:$0xff] }
   0x4   :  { %180 = vmatpush3.bf16.msra.mxu0 %v179_v5  ;;  %v188_v13 = vpack.c.bf16 %v35_v12, %v34_v11  ;;  %v37_v15 = vld [vmem:[%s285_s1 + $0x48] sm:$0xff]  ;;  %v38_v17 = vld [vmem:[%s285_s1 + $0x50] sm:$0xff]  ;;  %v39_v18 = vld [vmem:[%s285_s1 + $0x58] sm:$0xff] }
   0x5   :  { %181 = vmatprep.subr.bf16.mxu0 %v205_v0  ;;  %v191_v16 = vpack.c.bf16 %v37_v15, %v36_v14  ;;  %v194_v19 = vpack.c.bf16 %v39_v18, %v38_v17  ;;  %v40_v20 = vld [vmem:[%s285_s1 + $0x60] sm:$0xff]  ;;  %v41_v21 = vld [vmem:[%s285_s1 + $0x68] sm:$0xff]  ;;  %v42_v23 = vld [vmem:[%s285_s1 + $0x70] sm:$0xff] }
   0x6   :  { %v197_v22 = vpack.c.bf16 %v41_v21, %v40_v20  ;;  %v43_v24 = vld [vmem:[%s285_s1 + $0x78] sm:$0xff]  ;;  %v27_v26 = vld [vmem:[%s286_s0] sm:$0xff] }
   0x7   :  { %v200_v25 = vpack.c.bf16 %v43_v24, %v42_v23  ;;  %v125_v27 = vld [vmem:[%s287_s2] ss:$0 sm:$0xff] }
   0x8   :  { %183 = vmatpush3.bf16.msra.mxu0 %v182_v7 }
   0x9   :  { %184 = vmatprep.subr.bf16.mxu0 %v205_v0 }
   0xc   :  { %186 = vmatpush3.bf16.msra.mxu0 %v185_v10 }
   0xd   :  { %187 = vmatprep.subr.bf16.mxu0 %v205_v0 }
  0x10   :  { %189 = vmatpush3.bf16.msra.mxu0 %v188_v13 }
  0x11   :  { %190 = vmatprep.subr.bf16.mxu0 %v205_v0 }
  0x14   :  { %192 = vmatpush3.bf16.msra.mxu0 %v191_v16 }
  0x15   :  { %193 = vmatprep.subr.bf16.mxu0 %v205_v0 }
  0x18   :  { %195 = vmatpush3.bf16.msra.mxu0 %v194_v19 }
  0x19   :  { %196 = vmatprep.subr.bf16.mxu0 %v205_v0 }
  0x1c   :  { %198 = vmatpush3.bf16.msra.mxu0 %v197_v22 }
  0x1d   :  { %199 = vmatprep.subr.bf16.mxu0 %v205_v0 }
  0x20   :  { %201 = vmatpush3.bf16.msra.mxu0 %v200_v25 }
  0x23   :  { %176 = vmatmul.mubr.f32.vlgmr.msra.gmra.mrb[0].mxu0 %v27_v26 }
  0xf6   :  { %v110_v28 = vpop.f32.mrb[0].mxu0 }
  0xf7   :  { %v114_v29 = vadd.f32 %v125_v27, %v110_v28  ;;  %v177_v30 = vpop.f32.mrb[1].mxu0 }
  0xf9   :  { %120 = vst [vmem:[%s288_s3] sm:$0xff] %v114_v29 }

</bundles_post_ra>
